<compile_context>
chip_gen: v7x
topology: tpu7x:2x2x1
jax: 0.10.0
libtpu: 0.0.40
codegen_flags: <defaults>
</compile_context>

<pallas_src>
import functools

import jax
import jax.numpy as jnp
from jax import lax
from jax.experimental import pallas as pl
from jax.experimental.pallas import tpu as pltpu

_NORMALIZE_EPS = 1e-12   # F.normalize default
_PAIRDIST_EPS = 1e-6     # F.pairwise_distance default


def _round_up(x, m):
    return (x + m - 1) // m * m


def _cdiv(a, b):
    return (a + b - 1) // b


def _contrastive_loss_kernel(s_ref, t_ref, lab_ref, o_ref, acc_ref, *,
                             margin, true_b, true_d, tb, d_rem,
                             mask_cols, mask_rows):
    # s_ref, t_ref : (TB, TD) feature tiles (last D / B blocks may be partial ->
    #                out-of-range elements are unspecified and masked below)
    # lab_ref      : (TB, 1) labels (resident across the D axis)
    # o_ref        : (1, 8, 128) per-B-tile loss sum (broadcast, lane-dense)
    # acc_ref      : (TB, 8) f32 scratch; columns 0..4 = ss, tt, st, sum_s, sum_t
    #
    # All grid queries happen HERE (top level), never inside pl.when closures.
    i = pl.program_id(0)
    k = pl.program_id(1)
    n_k = pl.num_programs(1)
    row_start = i * tb
    is_last_k = k == n_k - 1

    @pl.when(k == 0)
    def _init():
        acc_ref[...] = jnp.zeros_like(acc_ref)

    def _accumulate(apply_col_mask):
        s = s_ref[...].astype(jnp.float32)
        t = t_ref[...].astype(jnp.float32)
        if apply_col_mask:
            # Zero the D tail of the (partial) last block BEFORE any products,
            # so unspecified (possibly NaN/inf) padding never reaches the sums.
            col = lax.broadcasted_iota(jnp.int32, s.shape, 1)
            valid = col < d_rem
            zero = jnp.zeros_like(s)
            s = jnp.where(valid, s, zero)
            t = jnp.where(valid, t, zero)
        acc_ref[:, 0:1] += jnp.sum(s * s, axis=1, keepdims=True)
        acc_ref[:, 1:2] += jnp.sum(t * t, axis=1, keepdims=True)
        acc_ref[:, 2:3] += jnp.sum(s * t, axis=1, keepdims=True)
        acc_ref[:, 3:4] += jnp.sum(s, axis=1, keepdims=True)
        acc_ref[:, 4:5] += jnp.sum(t, axis=1, keepdims=True)

    if mask_cols:
        # Static split: only the last reduction step pays for the column mask.
        @pl.when(is_last_k)
        def _acc_masked():
            _accumulate(True)

        @pl.when(jnp.logical_not(is_last_k))
        def _acc_plain():
            _accumulate(False)
    else:
        _accumulate(False)

    @pl.when(is_last_k)
    def _finalize():
        ss = acc_ref[:, 0:1]
        tt = acc_ref[:, 1:2]
        st = acc_ref[:, 2:3]
        su = acc_ref[:, 3:4]
        tu = acc_ref[:, 4:5]

        ns = jnp.maximum(jnp.sqrt(ss), _NORMALIZE_EPS)
        nt = jnp.maximum(jnp.sqrt(tt), _NORMALIZE_EPS)
        inv_ns = 1.0 / ns          # per-row only; plain divide (cheap, robust)
        inv_nt = 1.0 / nt

        e = jnp.float32(_PAIRDIST_EPS)
        # || s/ns - t/nt + e ||^2 expanded; true_d is the UNPADDED feature dim.
        d2 = (ss * inv_ns * inv_ns
              + tt * inv_nt * inv_nt
              + jnp.float32(true_d) * e * e
              - 2.0 * st * (inv_ns * inv_nt)
              + 2.0 * e * (su * inv_ns - tu * inv_nt))
        d2 = jnp.maximum(d2, 0.0)                # guard tiny negative cancellation
        dist = jnp.sqrt(d2)

        lab = lab_ref[...].astype(jnp.float32)   # (TB, 1)
        hinge = jnp.maximum(jnp.float32(margin) - dist, 0.0)
        per = 0.5 * (lab * d2 + (1.0 - lab) * hinge * hinge)

        if mask_rows:
            # Rows past the true batch size come from a partial B block; drop them
            # (jnp.where selects, so NaN/inf garbage in those rows never propagates).
            rows = lax.broadcasted_iota(jnp.int32, per.shape, 0) + row_start
            per = jnp.where(rows < true_b, per, jnp.zeros_like(per))

        # Lane-dense output: broadcast this B-tile's loss sum over an (8,128) block.
        o_ref[...] = jnp.full(o_ref.shape, jnp.sum(per), dtype=jnp.float32)


def contrastive_loss(source_features, target_features, labels, margin=1.0,
                     block_b=256, block_d=4096):
    """source_features/target_features: (B, C, H, W) NCHW. labels: (B,)."""
    b = source_features.shape[0]
    s_flat = source_features.reshape(b, -1)          # view-level reshape, no HBM copy
    t_flat = target_features.reshape(b, -1)
    d = s_flat.shape[1]
    lab = jnp.asarray(labels).astype(jnp.float32).reshape(b, 1)

    # ---- B tile: multiple of 8 (f32 sublanes) unless B itself is tiny.
    # Cap at ceil(B/2) rounded up so batches that fit one block still produce
    # >= 2 "parallel" B blocks (v7x: shards across both TensorCores).
    if b <= 8:
        tb = b                                        # block == full dim (allowed)
    else:
        tb = max(8, min(_round_up(int(block_b), 8), _round_up(_cdiv(b, 2), 8)))
    n_b = _cdiv(b, tb)
    mask_rows = (b % tb) != 0

    # ---- D tile: multiple of 128 (lanes) unless D fits in a single block.
    if d <= block_d:
        td = d                                        # block == full dim (allowed)
    else:
        td = _round_up(int(block_d), 128)
    n_d = _cdiv(d, td)
    d_rem = d - (n_d - 1) * td                        # valid columns in last D block
    mask_cols = (n_d > 1) and ((d % td) != 0)

    kernel = functools.partial(
        _contrastive_loss_kernel,
        margin=float(margin), true_b=b, true_d=d, tb=tb, d_rem=d_rem,
        mask_cols=mask_cols, mask_rows=mask_rows)

    partials = pl.pallas_call(
        kernel,
        out_shape=jax.ShapeDtypeStruct((n_b, 8, 128), jnp.float32),
        grid_spec=pltpu.PrefetchScalarGridSpec(
            num_scalar_prefetch=0,
            grid=(n_b, n_d),                                   # D (reduction) axis last
            in_specs=[
                pl.BlockSpec((tb, td), lambda i, k: (i, k)),   # source tile
                pl.BlockSpec((tb, td), lambda i, k: (i, k)),   # target tile
                pl.BlockSpec((tb, 1), lambda i, k: (i, 0)),    # labels (resident over k)
            ],
            out_specs=pl.BlockSpec((1, 8, 128), lambda i, k: (i, 0, 0)),
            scratch_shapes=[pltpu.VMEM((tb, 8), jnp.float32)],
        ),
        compiler_params=pltpu.CompilerParams(
            dimension_semantics=("parallel", "arbitrary"),
            vmem_limit_bytes=32 * 1024 * 1024,   # defaults use ~16 MiB double-buffered
        ),
    )(s_flat, t_flat, lab)

    # Tiny final reduction of per-B-tile partial sums; divide by the TRUE batch size.
    return jnp.sum(partials[:, 0, 0]) / jnp.float32(b)


def _reference(s, t, y, margin=1.0):
    s = s.reshape(s.shape[0], -1).astype(jnp.float32)
    t = t.reshape(t.shape[0], -1).astype(jnp.float32)
    s = s / jnp.maximum(jnp.linalg.norm(s, axis=1, keepdims=True), _NORMALIZE_EPS)
    t = t / jnp.maximum(jnp.linalg.norm(t, axis=1, keepdims=True), _NORMALIZE_EPS)
    dist = jnp.sqrt(jnp.sum((s - t + _PAIRDIST_EPS) ** 2, axis=1))
    y = y.astype(jnp.float32)
    l = 0.5 * (y * dist ** 2 + (1.0 - y) * jnp.maximum(margin - dist, 0.0) ** 2)
    return jnp.mean(l)


if __name__ == "__main__":
    key = jax.random.PRNGKey(0)

    # Case 1: small shape from the spec (B=2, C=4, H=W=16) -> D=1024.
    k1, k2, k3, key = jax.random.split(key, 4)
    B, C, H, W = 2, 4, 16, 16
    src1 = jax.random.normal(k1, (B, C, H, W), dtype=jnp.float32)
    tgt1 = jax.random.normal(k2, (B, C, H, W), dtype=jnp.float32)
    lab1 = jax.random.bernoulli(k3, p=0.5, shape=(B,)).astype(jnp.float32)

    out_a = contrastive_loss(src1, tgt1, lab1, margin=1.0)         # single-tile grid
    jax.block_until_ready(out_a)
    ref_a = _reference(src1, tgt1, lab1, margin=1.0)
    assert jnp.allclose(out_a, ref_a, rtol=2e-5, atol=1e-5), (out_a, ref_a)

    # Small D tiles: exercises D-axis accumulation + partial last D block
    # (D=1024, td=384 -> d_rem=256) with tiny B (tb = B = 2, no row mask).
    out_b = contrastive_loss(src1, tgt1, lab1, margin=1.0, block_b=8, block_d=384)
    jax.block_until_ready(out_b)
    assert jnp.allclose(out_b, ref_a, rtol=2e-5, atol=1e-5), (out_b, ref_a)

    # Case 2: multiple B tiles (B=16, tb=8) and 5 D tiles with a partial tail
    # (D=1200, td=256 -> d_rem=176).
    k4, k5, k6, key = jax.random.split(key, 4)
    B2, C2, H2, W2 = 16, 3, 20, 20
    src2 = jax.random.normal(k4, (B2, C2, H2, W2), dtype=jnp.float32)
    tgt2 = jax.random.normal(k5, (B2, C2, H2, W2), dtype=jnp.float32)
    lab2 = jax.random.bernoulli(k6, p=0.5, shape=(B2,)).astype(jnp.float32)

    out_c = contrastive_loss(src2, tgt2, lab2, margin=1.0, block_b=8, block_d=256)
    jax.block_until_ready(out_c)
    ref_c = _reference(src2, tgt2, lab2, margin=1.0)
    assert jnp.allclose(out_c, ref_c, rtol=2e-5, atol=1e-5), (out_c, ref_c)

    # Case 3: ragged batch (B=10 -> tb=8, partial last B block masked per-row)
    # plus a partial last D block.
    k7, k8, k9, key = jax.random.split(key, 4)
    B3, C3, H3, W3 = 10, 3, 20, 20
    src3 = jax.random.normal(k7, (B3, C3, H3, W3), dtype=jnp.float32)
    tgt3 = jax.random.normal(k8, (B3, C3, H3, W3), dtype=jnp.float32)
    lab3 = jax.random.bernoulli(k9, p=0.5, shape=(B3,)).astype(jnp.float32)

    out_d = contrastive_loss(src3, tgt3, lab3, margin=1.0, block_b=256, block_d=512)
    jax.block_until_ready(out_d)
    ref_d = _reference(src3, tgt3, lab3, margin=1.0)
    assert jnp.allclose(out_d, ref_d, rtol=2e-5, atol=1e-5), (out_d, ref_d)

    print("KERNEL_OK")
</pallas_src>

<mosaic_0001>
module attributes {stable_mosaic.version = 11 : i64} {
  func.func @_contrastive_loss_kernel(%arg0: i32, %arg1: i32, %arg2: memref<2x1024xf32, #tpu.memory_space<vmem>>, %arg3: memref<2x1024xf32, #tpu.memory_space<vmem>>, %arg4: memref<2x1xf32, #tpu.memory_space<vmem>>, %arg5: memref<1x8x128xf32, #tpu.memory_space<vmem>>, %arg6: memref<2x8xf32, #tpu.memory_space<vmem>>) attributes {dimension_semantics = [#tpu.dimension_semantics<parallel>, #tpu.dimension_semantics<arbitrary>], iteration_bounds = array<i64: 1, 1>, scalar_prefetch = 0 : i64, scratch_operands = 1 : i64, tpu.core_type = #tpu.core_type<tc>, window_params = [{transform_indices = @transform_0, window_bounds = array<i64: 2, 1024>}, {transform_indices = @transform_1, window_bounds = array<i64: 2, 1024>}, {transform_indices = @transform_2, window_bounds = array<i64: 2, 1>}, {transform_indices = @transform_3, window_bounds = array<i64: 1, 8, 128>}]} {
    %c0_i32 = arith.constant 0 : i32
    %0 = arith.cmpi eq, %arg1, %c0_i32 : i32
    %c0_i32_0 = arith.constant 0 : i32
    %1 = arith.cmpi eq, %arg1, %c0_i32_0 : i32
    %2 = arith.extui %1 : i1 to i32
    %c0_i32_1 = arith.constant 0 : i32
    %3 = arith.cmpi ne, %2, %c0_i32_1 : i32
    scf.if %3 {
      %cst_26 = arith.constant 0.000000e+00 : f32
      %36 = vector.broadcast %cst_26 : f32 to vector<2x8xf32>
      %c0_27 = arith.constant 0 : index
      %c0_28 = arith.constant 0 : index
      %37 = vector.load %arg6[%c0_27, %c0_28] : memref<2x8xf32, #tpu.memory_space<vmem>>, vector<2x8xf32>
      tpu.vector_store %arg6[%c0_27, %c0_28], %36 {strides = array<i32>} : memref<2x8xf32, #tpu.memory_space<vmem>>, vector<2x8xf32>,
    } else {
    }
    %c0 = arith.constant 0 : index
    %c0_2 = arith.constant 0 : index
    %4 = vector.load %arg2[%c0, %c0_2] : memref<2x1024xf32, #tpu.memory_space<vmem>>, vector<2x1024xf32>
    %c0_3 = arith.constant 0 : index
    %c0_4 = arith.constant 0 : index
    %5 = vector.load %arg3[%c0_3, %c0_4] : memref<2x1024xf32, #tpu.memory_space<vmem>>, vector<2x1024xf32>
    %c0_5 = arith.constant 0 : index
    %c0_6 = arith.constant 0 : index
    %6 = vector.load %arg6[%c0_5, %c0_6] : memref<2x8xf32, #tpu.memory_space<vmem>>, vector<2x1xf32>
    %7 = arith.mulf %4, %4 : vector<2x1024xf32>
    %cst = arith.constant dense<0.000000e+00> : vector<2xf32>
    %8 = vector.multi_reduction <add>, %7, %cst [1] : vector<2x1024xf32> to vector<2xf32>
    %9 = vector.shape_cast %8 : vector<2xf32> to vector<2x1xf32>
    %10 = arith.addf %6, %9 : vector<2x1xf32>
    %c0_7 = arith.constant 0 : index
    %c0_8 = arith.constant 0 : index
    %11 = vector.load %arg6[%c0_7, %c0_8] : memref<2x8xf32, #tpu.memory_space<vmem>>, vector<2x1xf32>
    tpu.vector_store %arg6[%c0_7, %c0_8], %10 {strides = array<i32>} : memref<2x8xf32, #tpu.memory_space<vmem>>, vector<2x1xf32>,
    %c0_9 = arith.constant 0 : index
    %c1 = arith.constant 1 : index
    %12 = vector.load %arg6[%c0_9, %c1] : memref<2x8xf32, #tpu.memory_space<vmem>>, vector<2x1xf32>
    %13 = arith.mulf %5, %5 : vector<2x1024xf32>
    %cst_10 = arith.constant dense<0.000000e+00> : vector<2xf32>
    %14 = vector.multi_reduction <add>, %13, %cst_10 [1] : vector<2x1024xf32> to vector<2xf32>
    %15 = vector.shape_cast %14 : vector<2xf32> to vector<2x1xf32>
    %16 = arith.addf %12, %15 : vector<2x1xf32>
    %c0_11 = arith.constant 0 : index
    %c1_12 = arith.constant 1 : index
    %17 = vector.load %arg6[%c0_11, %c1_12] : memref<2x8xf32, #tpu.memory_space<vmem>>, vector<2x1xf32>
    tpu.vector_store %arg6[%c0_11, %c1_12], %16 {strides = array<i32>} : memref<2x8xf32, #tpu.memory_space<vmem>>, vector<2x1xf32>,
    %c0_13 = arith.constant 0 : index
    %c2 = arith.constant 2 : index
    %18 = vector.load %arg6[%c0_13, %c2] : memref<2x8xf32, #tpu.memory_space<vmem>>, vector<2x1xf32>
    %19 = arith.mulf %4, %5 : vector<2x1024xf32>
    %cst_14 = arith.constant dense<0.000000e+00> : vector<2xf32>
    %20 = vector.multi_reduction <add>, %19, %cst_14 [1] : vector<2x1024xf32> to vector<2xf32>
    %21 = vector.shape_cast %20 : vector<2xf32> to vector<2x1xf32>
    %22 = arith.addf %18, %21 : vector<2x1xf32>
    %c0_15 = arith.constant 0 : index
    %c2_16 = arith.constant 2 : index
    %23 = vector.load %arg6[%c0_15, %c2_16] : memref<2x8xf32, #tpu.memory_space<vmem>>, vector<2x1xf32>
    tpu.vector_store %arg6[%c0_15, %c2_16], %22 {strides = array<i32>} : memref<2x8xf32, #tpu.memory_space<vmem>>, vector<2x1xf32>,
    %c0_17 = arith.constant 0 : index
    %c3 = arith.constant 3 : index
    %24 = vector.load %arg6[%c0_17, %c3] : memref<2x8xf32, #tpu.memory_space<vmem>>, vector<2x1xf32>
    %cst_18 = arith.constant dense<0.000000e+00> : vector<2xf32>
    %25 = vector.multi_reduction <add>, %4, %cst_18 [1] : vector<2x1024xf32> to vector<2xf32>
    %26 = vector.shape_cast %25 : vector<2xf32> to vector<2x1xf32>
    %27 = arith.addf %24, %26 : vector<2x1xf32>
    %c0_19 = arith.constant 0 : index
    %c3_20 = arith.constant 3 : index
    %28 = vector.load %arg6[%c0_19, %c3_20] : memref<2x8xf32, #tpu.memory_space<vmem>>, vector<2x1xf32>
    tpu.vector_store %arg6[%c0_19, %c3_20], %27 {strides = array<i32>} : memref<2x8xf32, #tpu.memory_space<vmem>>, vector<2x1xf32>,
    %c0_21 = arith.constant 0 : index
    %c4 = arith.constant 4 : index
    %29 = vector.load %arg6[%c0_21, %c4] : memref<2x8xf32, #tpu.memory_space<vmem>>, vector<2x1xf32>
    %cst_22 = arith.constant dense<0.000000e+00> : vector<2xf32>
    %30 = vector.multi_reduction <add>, %5, %cst_22 [1] : vector<2x1024xf32> to vector<2xf32>
    %31 = vector.shape_cast %30 : vector<2xf32> to vector<2x1xf32>
    %32 = arith.addf %29, %31 : vector<2x1xf32>
    %c0_23 = arith.constant 0 : index
    %c4_24 = arith.constant 4 : index
    %33 = vector.load %arg6[%c0_23, %c4_24] : memref<2x8xf32, #tpu.memory_space<vmem>>, vector<2x1xf32>
    tpu.vector_store %arg6[%c0_23, %c4_24], %32 {strides = array<i32>} : memref<2x8xf32, #tpu.memory_space<vmem>>, vector<2x1xf32>,
    %34 = arith.extui %0 : i1 to i32
    %c0_i32_25 = arith.constant 0 : i32
    %35 = arith.cmpi ne, %34, %c0_i32_25 : i32
    scf.if %35 {
      %c0_26 = arith.constant 0 : index
      %c0_27 = arith.constant 0 : index
      %36 = vector.load %arg6[%c0_26, %c0_27] : memref<2x8xf32, #tpu.memory_space<vmem>>, vector<2x1xf32>
      %c0_28 = arith.constant 0 : index
      %c1_29 = arith.constant 1 : index
      %37 = vector.load %arg6[%c0_28, %c1_29] : memref<2x8xf32, #tpu.memory_space<vmem>>, vector<2x1xf32>
      %c0_30 = arith.constant 0 : index
      %c2_31 = arith.constant 2 : index
      %38 = vector.load %arg6[%c0_30, %c2_31] : memref<2x8xf32, #tpu.memory_space<vmem>>, vector<2x1xf32>
      %c0_32 = arith.constant 0 : index
      %c3_33 = arith.constant 3 : index
      %39 = vector.load %arg6[%c0_32, %c3_33] : memref<2x8xf32, #tpu.memory_space<vmem>>, vector<2x1xf32>
      %c0_34 = arith.constant 0 : index
      %c4_35 = arith.constant 4 : index
      %40 = vector.load %arg6[%c0_34, %c4_35] : memref<2x8xf32, #tpu.memory_space<vmem>>, vector<2x1xf32>
      %41 = math.sqrt %36 : vector<2x1xf32>
      %cst_36 = arith.constant 9.99999996E-13 : f32
      %42 = vector.broadcast %cst_36 : f32 to vector<2x1xf32>
      %43 = arith.maximumf %41, %42 : vector<2x1xf32>
      %44 = math.sqrt %37 : vector<2x1xf32>
      %cst_37 = arith.constant 9.99999996E-13 : f32
      %45 = vector.broadcast %cst_37 : f32 to vector<2x1xf32>
      %46 = arith.maximumf %44, %45 : vector<2x1xf32>
      %cst_38 = arith.constant 1.000000e+00 : f32
      %47 = vector.broadcast %cst_38 : f32 to vector<2x1xf32>
      %48 = arith.divf %47, %43 : vector<2x1xf32>
      %cst_39 = arith.constant 1.000000e+00 : f32
      %49 = vector.broadcast %cst_39 : f32 to vector<2x1xf32>
      %50 = arith.divf %49, %46 : vector<2x1xf32>
      %51 = arith.mulf %36, %48 : vector<2x1xf32>
      %52 = arith.mulf %51, %48 : vector<2x1xf32>
      %53 = arith.mulf %37, %50 : vector<2x1xf32>
      %54 = arith.mulf %53, %50 : vector<2x1xf32>
      %55 = arith.addf %52, %54 : vector<2x1xf32>
      %cst_40 = arith.constant 1.024000e+03 : f32
      %cst_41 = arith.constant 9.99999997E-7 : f32
      %56 = arith.mulf %cst_40, %cst_41 : f32
      %cst_42 = arith.constant 9.99999997E-7 : f32
      %57 = arith.mulf %56, %cst_42 : f32
      %58 = vector.broadcast %57 : f32 to vector<2x1xf32>
      %59 = arith.addf %55, %58 : vector<2x1xf32>
      %cst_43 = arith.constant 2.000000e+00 : f32
      %60 = vector.broadcast %cst_43 : f32 to vector<2x1xf32>
      %61 = arith.mulf %60, %38 : vector<2x1xf32>
      %62 = arith.mulf %48, %50 : vector<2x1xf32>
      %63 = arith.mulf %61, %62 : vector<2x1xf32>
      %64 = arith.subf %59, %63 : vector<2x1xf32>
      %cst_44 = arith.constant 2.000000e+00 : f32
      %cst_45 = arith.constant 9.99999997E-7 : f32
      %65 = arith.mulf %cst_44, %cst_45 : f32
      %66 = arith.mulf %39, %48 : vector<2x1xf32>
      %67 = arith.mulf %40, %50 : vector<2x1xf32>
      %68 = arith.subf %66, %67 : vector<2x1xf32>
      %69 = vector.broadcast %65 : f32 to vector<2x1xf32>
      %70 = arith.mulf %69, %68 : vector<2x1xf32>
      %71 = arith.addf %64, %70 : vector<2x1xf32>
      %cst_46 = arith.constant 0.000000e+00 : f32
      %72 = vector.broadcast %cst_46 : f32 to vector<2x1xf32>
      %73 = arith.maximumf %71, %72 : vector<2x1xf32>
      %74 = math.sqrt %73 : vector<2x1xf32>
      %c0_47 = arith.constant 0 : index
      %c0_48 = arith.constant 0 : index
      %75 = vector.load %arg4[%c0_47, %c0_48] : memref<2x1xf32, #tpu.memory_space<vmem>>, vector<2x1xf32>
      %cst_49 = arith.constant 1.000000e+00 : f32
      %76 = vector.broadcast %cst_49 : f32 to vector<2x1xf32>
      %77 = arith.subf %76, %74 : vector<2x1xf32>
      %cst_50 = arith.constant 0.000000e+00 : f32
      %78 = vector.broadcast %cst_50 : f32 to vector<2x1xf32>
      %79 = arith.maximumf %77, %78 : vector<2x1xf32>
      %80 = arith.mulf %75, %73 : vector<2x1xf32>
      %cst_51 = arith.constant 1.000000e+00 : f32
      %81 = vector.broadcast %cst_51 : f32 to vector<2x1xf32>
      %82 = arith.subf %81, %75 : vector<2x1xf32>
      %83 = arith.mulf %82, %79 : vector<2x1xf32>
      %84 = arith.mulf %83, %79 : vector<2x1xf32>
      %85 = arith.addf %80, %84 : vector<2x1xf32>
      %cst_52 = arith.constant 5.000000e-01 : f32
      %86 = vector.broadcast %cst_52 : f32 to vector<2x1xf32>
      %87 = arith.mulf %86, %85 : vector<2x1xf32>
      %88 = vector.shape_cast %87 : vector<2x1xf32> to vector<1x2x1xf32>
      %cst_53 = arith.constant dense<0.000000e+00> : vector<1xf32>
      %89 = vector.multi_reduction <add>, %88, %cst_53 [1, 2] : vector<1x2x1xf32> to vector<1xf32>
      %90 = vector.shape_cast %89 : vector<1xf32> to vector<1x1x1xf32>
      %91 = vector.extract %90[0, 0, 0] : f32 from vector<1x1x1xf32>
      %92 = vector.broadcast %91 : f32 to vector<1x8x128xf32>
      %c0_54 = arith.constant 0 : index
      %c0_55 = arith.constant 0 : index
      %c0_56 = arith.constant 0 : index
      %93 = vector.load %arg5[%c0_54, %c0_55, %c0_56] : memref<1x8x128xf32, #tpu.memory_space<vmem>>, vector<1x8x128xf32>
      tpu.vector_store %arg5[%c0_54, %c0_55, %c0_56], %92 {strides = array<i32>} : memref<1x8x128xf32, #tpu.memory_space<vmem>>, vector<1x8x128xf32>,
    } else {
    }
    return
  }
  func.func @transform_0(%arg0: i32, %arg1: i32) -> (i32, i32) {
    %c0_i32 = arith.constant 0 : i32
    return %arg0, %arg1 : i32, i32
  }
  func.func @transform_1(%arg0: i32, %arg1: i32) -> (i32, i32) {
    %c0_i32 = arith.constant 0 : i32
    return %arg0, %arg1 : i32, i32
  }
  func.func @transform_2(%arg0: i32, %arg1: i32) -> (i32, i32) {
    %c0_i32 = arith.constant 0 : i32
    %c0_i32_0 = arith.constant 0 : i32
    return %arg0, %c0_i32 : i32, i32
  }
  func.func @transform_3(%arg0: i32, %arg1: i32) -> (i32, i32, i32) {
    %c0_i32 = arith.constant 0 : i32
    %c0_i32_0 = arith.constant 0 : i32
    %c0_i32_1 = arith.constant 0 : i32
    return %arg0, %c0_i32, %c0_i32_0 : i32, i32, i32
  }
}

</mosaic_0001>

<bundles_post_ra>
// kernel: tpu_custom_call.1
= control target key start
LH: loop header
LB: loop body
LE: loop exit
PB: predicated region body
PF: predicated region fallthrough
CT: control target
= control target key end

     0   :  { %8 = vsyncpa [#allocation4], 0  ;;  %s738_s0 = inlined_call_operand.hbm [shape: f32[2,1024], index: 0, kind: input, shape index: {}]   ;;  %s739_s1 = inlined_call_operand.hbm [shape: f32[2,1024], index: 1, kind: input, shape index: {}]   ;;  %s740_s2 = inlined_call_operand.vmem [shape: f32[2,1], index: 2, kind: input, shape index: {}]   ;;  %s741_s3 = inlined_call_operand.hbm [shape: f32[1,8,128], index: 3, kind: output, shape index: {}]  }
   0x1   :  { %9 = vsyncpa [#allocation7], 0 }
   0x2   :  { %10 = vsyncpa [#allocation5], 0  ;;  %s573_s12 = smov [#allocation3]   ;;  %s574_s14 = smov [#allocation6]  }
   0x3   :  { %s17_s13 = sshll.u32 %s573_s12, 4  ;;  %s27_s15 = sshll.u32 %s574_s14, 4  ;;  %s18_s13 = int_to_ptr.vmem [resolvable:$true] %s17_s13  ;;  %s28_s15 = int_to_ptr.vmem [resolvable:$true] %s27_s15 }
   0x4   :  { %s501_s18 = scalar_lea.hbm %s738_s0, 256 }
   0x5   :  { %p502_p0 = scmp.ne.s32.totalorder %s738_s0, %s501_s18  ;;  %p505_p1 = scmp.lt.u32.totalorder %s501_s18, %s738_s0 }
   0x7   :  { %p507_p2 = pnand %p505_p1, %p502_p0 }
   0x9   :  { %510 = shalt.err (!%p507_p2)
}
   0xa   :  { %s511_s23 = scalar_lea.vmem %s18_s13, 256  ;;  %p516_p4 = scmp.lt.s32.totalorder %s18_s13, %s18_s13 }
   0xb   :  { %p512_p3 = scmp.ne.s32.totalorder %s18_s13, %s511_s23  ;;  %p517_p5 = scmp.lt.s32.totalorder %s511_s23, %s511_s23 }
   0xd   :  { %p518_p6 = por %p517_p5, %p516_p4 }
   0xf   :  { %p519_p7 = pnand %p518_p6, %p512_p3 }
  0x11   :  { %522 = shalt.err (!%p519_p7)
}
  0x12   :  { %20 = dma.hbm_to_vmem [thread:$0]  %s738_s0, 256, %s18_s13, [#allocation4]  }
  0x13   :  { %s523_s28 = scalar_lea.hbm %s739_s1, 256 }
  0x14   :  { %p524_p8 = scmp.ne.s32.totalorder %s739_s1, %s523_s28  ;;  %p527_p9 = scmp.lt.u32.totalorder %s523_s28, %s739_s1 }
  0x16   :  { %p529_p10 = pnand %p527_p9, %p524_p8 }
  0x18   :  { %532 = shalt.err (!%p529_p10)
}
  0x19   :  { %s533_s6 = scalar_lea.vmem %s28_s15, 256  ;;  %p538_p12 = scmp.lt.s32.totalorder %s28_s15, %s28_s15 }
  0x1a   :  { %p534_p11 = scmp.ne.s32.totalorder %s28_s15, %s533_s6  ;;  %p539_p13 = scmp.lt.s32.totalorder %s533_s6, %s533_s6 }
  0x1c   :  { %p540_p0 = por %p539_p13, %p538_p12 }
  0x1e   :  { %p541_p1 = pnand %p540_p0, %p534_p11 }
  0x20   :  { %544 = shalt.err (!%p541_p1)
}
  0x21   :  { %30 = dma.hbm_to_vmem [thread:$0]  %s739_s1, 256, %s28_s15, [#allocation7]  }
  0x22   :  { %567 = dma.done.wait [#allocation4], 256  }
  0x23   :  { %568 = vsyncadd [#allocation4], 4294967040 }
  0x24   :  { %569 = dma.done.wait [#allocation7], 256  }
  0x25   :  { %570 = vsyncadd [#allocation7], 4294967040  ;;  %v58_v0 = vlaneseq  ;;  %vm43_vm0 = vcmask 58368   ;;  %v575_v1 = vmov 1983009808   ;;  %v576_v4 = vmov 0.0  }
  0x26   :  { %v56_v2 = vunpack.c.l.s4 %v575_v1  ;;  %44 = vst.msk [vmem:[#allocation2] sm:$0x3] %vm43_vm0, %v576_v4  ;;  %v629_v7 = vld [vmem:[#allocation3] sm:$0xff]  ;;  %v631_v8 = vld [vmem:[#allocation3 + $0x8] sm:$0xff]  ;;  %v633_v9 = vld [vmem:[#allocation6] sm:$0xff]  ;;  %vm96_vm1 = vcmask 1041408  }
  0x27   :  { %v59_v3 = vshrl.u32 %v58_v0, 7  ;;  %v50_v10 = vmul.f32 %v629_v7, %v629_v7  ;;  %v51_v11 = vmul.f32 %v631_v8, %v631_v8  ;;  %v639_v12 = vld [vmem:[#allocation6 + $0x8] sm:$0xff]  ;;  %v118_v13 = vmul.f32 %v633_v9, %v633_v9  ;;  %s577_s1 = smov 3   ;;  %s578_s8 = smov 127  }
  0x28   :  { %v57_v5 = vunpack.c.0.s8 %v56_v2  ;;  %v119_v14 = vmul.f32 %v639_v12, %v639_v12  ;;  %v185_v15 = vmul.f32 %v633_v9, %v629_v7  ;;  %v186_v23 = vmul.f32 %v639_v12, %v631_v8  ;;  %s579_s9 = smov 2   ;;  %s580_s10 = smov 126  }
  0x29   :  { %v54_v16 = vcombine.high %v50_v10, %v50_v10  ;;  %v71_v18 = vcombine.high %v51_v11, %v51_v11  ;;  %v122_v20 = vcombine.high %v118_v13, %v118_v13  ;;  %v254_v38 = vcombine.high %v629_v7, %v629_v7  ;;  %s581_s11 = smov 125  }
  0x2a   :  { %v627_v6 = vsub.s32 %v57_v5, %v59_v3  ;;  %v139_v22 = vcombine.high %v119_v14, %v119_v14  ;;  %v189_v55 = vcombine.high %v185_v15, %v185_v15  ;;  %v206_v59 = vcombine.high %v186_v23, %v186_v23 }
  0x2b   :  { %vm115_vm2 = vcmask 1024   ;;  %vm182_vm3 = vcmask 9224   ;;  %vm249_vm4 = vcmask 17424   ;;  %vm314_vm5 = vcmask 25624  }
  0x2c   :  { %v61_v17 = vrot.slane %v50_v10, %v627_v6  ;;  %v78_v19 = vrot.slane %v51_v11, %v627_v6  ;;  %v129_v21 = vrot.slane %v118_v13, %v627_v6  ;;  %v68_v24 = vrot.slane %v54_v16, %v627_v6 }
  0x2d   :  { %v85_v26 = vrot.slane %v71_v18, %v627_v6  ;;  %v146_v27 = vrot.slane %v119_v14, %v627_v6  ;;  %v136_v30 = vrot.slane %v122_v20, %v627_v6  ;;  %v261_v39 = vrot.slane %v629_v7, %v627_v6 }
  0x2e   :  { %v69_v25 = vcombine.high %v61_v17, %v61_v17  ;;  %v86_v28 = vcombine.high %v78_v19, %v78_v19  ;;  %v97_v29 = vsel %vm96_vm1, %v61_v17, 0.0  ;;  %v137_v31 = vcombine.high %v129_v21, %v129_v21 }
  0x2f   :  { %v70_v32 = vcombine.high %v68_v24, %v68_v24  ;;  %v87_v33 = vcombine.high %v85_v26, %v85_v26  ;;  %v100_v35 = vsel %vm96_vm1, %v68_v24, 0.0  ;;  %v138_v37 = vcombine.high %v136_v30, %v136_v30 }
  0x30   :  { %v98_v34 = vsel %vm96_vm1, %v69_v25, 0.0  ;;  %v104_v41 = vsel %vm96_vm1, %v78_v19, 0.0  ;;  %v153_v42 = vrot.slane %v139_v22, %v627_v6  ;;  %v154_v43 = vcombine.high %v146_v27, %v146_v27 }
  0x31   :  { %v99_v36 = vadd.f32 %v98_v34, %v97_v29  ;;  %v102_v40 = vsel %vm96_vm1, %v70_v32, 0.0  ;;  %v164_v45 = vsel %vm96_vm1, %v129_v21, 0.0  ;;  %v165_v46 = vsel %vm96_vm1, %v137_v31, 0.0 }
  0x32   :  { %v167_v47 = vsel %vm96_vm1, %v136_v30, 0.0  ;;  %v106_v48 = vsel %vm96_vm1, %v86_v28, 0.0  ;;  %v108_v49 = vsel %vm96_vm1, %v85_v26, 0.0  ;;  %v110_v50 = vsel %vm96_vm1, %v87_v33, 0.0 }
  0x33   :  { %v101_v44 = vadd.f32 %v100_v35, %v99_v36  ;;  %v166_v51 = vadd.f32 %v165_v46, %v164_v45  ;;  %v155_v53 = vcombine.high %v153_v42, %v153_v42  ;;  %v169_v54 = vsel %vm96_vm1, %v138_v37, 0.0 }
  0x34   :  { %v171_v57 = vsel %vm96_vm1, %v146_v27, 0.0  ;;  %v196_v58 = vrot.slane %v185_v15, %v627_v6  ;;  %v173_v61 = vsel %vm96_vm1, %v154_v43, 0.0  ;;  %v203_v62 = vrot.slane %v189_v55, %v627_v6 }
  0x35   :  { %v103_v52 = vadd.f32 %v102_v40, %v101_v44  ;;  %v168_v56 = vadd.f32 %v167_v47, %v166_v51  ;;  %v213_v63 = vrot.slane %v186_v23, %v627_v6  ;;  %v220_v2 = vrot.slane %v206_v59, %v627_v6 }
  0x36   :  { %v204_v1 = vcombine.high %v196_v58, %v196_v58  ;;  %v231_v3 = vsel %vm96_vm1, %v196_v58, 0.0  ;;  %v175_v5 = vsel %vm96_vm1, %v153_v42, 0.0  ;;  %v205_v7 = vcombine.high %v203_v62, %v203_v62 }
  0x37   :  { %v105_v60 = vadd.f32 %v104_v41, %v103_v52  ;;  %v170_v0 = vadd.f32 %v169_v54, %v168_v56  ;;  %v268_v10 = vrot.slane %v254_v38, %v627_v6  ;;  %v177_v13 = vsel %vm96_vm1, %v155_v53, 0.0 }
  0x38   :  { %v232_v14 = vsel %vm96_vm1, %v204_v1, 0.0  ;;  %v234_v15 = vsel %vm96_vm1, %v203_v62, 0.0  ;;  %v221_v17 = vcombine.high %v213_v63, %v213_v63  ;;  %v222_v18 = vcombine.high %v220_v2, %v220_v2 }
  0x39   :  { %v107_v4 = vadd.f32 %v106_v48, %v105_v60  ;;  %v172_v11 = vadd.f32 %v171_v57, %v170_v0  ;;  %v233_v19 = vadd.f32 %v232_v14, %v231_v3  ;;  %v236_v21 = vsel %vm96_vm1, %v205_v7, 0.0 }
  0x3a   :  { %v238_v22 = vsel %vm96_vm1, %v213_v63, 0.0  ;;  %v269_v23 = vcombine.high %v261_v39, %v261_v39  ;;  %v270_v26 = vcombine.high %v268_v10, %v268_v10  ;;  %v271_v27 = vcombine.high %v631_v8, %v631_v8 }
  0x3b   :  { %v109_v16 = vadd.f32 %v108_v49, %v107_v4  ;;  %v174_v20 = vadd.f32 %v173_v61, %v172_v11  ;;  %v235_v25 = vadd.f32 %v234_v15, %v233_v19  ;;  %v278_v29 = vrot.slane %v631_v8, %v627_v6 }
  0x3c   :  { %v296_v30 = vsel %vm96_vm1, %v261_v39, 0.0  ;;  %v297_v31 = vsel %vm96_vm1, %v269_v23, 0.0  ;;  %v285_v33 = vrot.slane %v271_v27, %v627_v6  ;;  %v299_v35 = vsel %vm96_vm1, %v268_v10, 0.0 }
  0x3d   :  { %v111_v24 = vadd.f32 %v110_v50, %v109_v16  ;;  %v176_v28 = vadd.f32 %v175_v5, %v174_v20  ;;  %v237_v32 = vadd.f32 %v236_v21, %v235_v25  ;;  %v298_v34 = vadd.f32 %v297_v31, %v296_v30 }
  0x3e   :  { %v240_v37 = vsel %vm96_vm1, %v221_v17, 0.0  ;;  %v286_v38 = vcombine.high %v278_v29, %v278_v29  ;;  %v301_v40 = vsel %vm96_vm1, %v270_v26, 0.0  ;;  %v242_v8 = vsel %vm96_vm1, %v220_v2, 0.0 }
  0x3f   :  { %112 = vadd.xlane.f32.xlu0 %v111_v24  ;;  %v178_v36 = vadd.f32 %v177_v13, %v176_v28  ;;  %v239_v41 = vadd.f32 %v238_v22, %v237_v32  ;;  %v244_v39 = vsel %vm96_vm1, %v222_v18, 0.0  ;;  %v300_v42 = vadd.f32 %v299_v35, %v298_v34  ;;  %v49_v18 = vld [vmem:[#allocation2] sm:$0x3] }
  0x40   :  { %v287_v43 = vcombine.high %v285_v33, %v285_v33  ;;  %v303_v44 = vsel %vm96_vm1, %v278_v29, 0.0  ;;  %v319_v45 = vcombine.high %v633_v9, %v633_v9  ;;  %v326_v46 = vrot.slane %v633_v9, %v627_v6 }
  0x41   :  { %v241_v47 = vadd.f32 %v240_v37, %v239_v41  ;;  %v302_v48 = vadd.f32 %v301_v40, %v300_v42  ;;  %v305_v49 = vsel %vm96_vm1, %v286_v38, 0.0  ;;  %v336_v50 = vcombine.high %v639_v12, %v639_v12 }
  0x42   :  { %v333_v51 = vrot.slane %v319_v45, %v627_v6  ;;  %v334_v52 = vcombine.high %v326_v46, %v326_v46  ;;  %v343_v53 = vrot.slane %v639_v12, %v627_v6  ;;  %v361_v54 = vsel %vm96_vm1, %v326_v46, 0.0 }
  0x43   :  { %179 = vadd.xlane.f32.xlu0 %v178_v36  ;;  %v243_v55 = vadd.f32 %v242_v8, %v241_v47  ;;  %v304_v56 = vadd.f32 %v303_v44, %v302_v48  ;;  %v307_v9 = vsel %vm96_vm1, %v285_v33, 0.0  ;;  %v309_v63 = vsel %vm96_vm1, %v287_v43, 0.0 }
  0x44   :  { %v335_v57 = vcombine.high %v333_v51, %v333_v51  ;;  %v362_v58 = vsel %vm96_vm1, %v334_v52, 0.0  ;;  %v364_v59 = vsel %vm96_vm1, %v333_v51, 0.0  ;;  %v350_v0 = vrot.slane %v336_v50, %v627_v6 }
  0x45   :  { %v245_v60 = vadd.f32 %v244_v39, %v243_v55  ;;  %v306_v61 = vadd.f32 %v305_v49, %v304_v56  ;;  %v363_v62 = vadd.f32 %v362_v58, %v361_v54  ;;  %v351_v1 = vcombine.high %v343_v53, %v343_v53 }
  0x46   :  { %v366_v12 = vsel %vm96_vm1, %v335_v57, 0.0  ;;  %v368_v4 = vsel %vm96_vm1, %v343_v53, 0.0  ;;  %v352_v10 = vcombine.high %v350_v0, %v350_v0  ;;  %v372_v14 = vsel %vm96_vm1, %v350_v0, 0.0  ;;  %v442_v0 = vld [vmem:[%s740_s2] sm:$0x3]  ;;  %s582_s2 = smov [#allocation8]  }
  0x47   :  { %246 = vadd.xlane.f32.xlu1 %v245_v60  ;;  %v308_v2 = vadd.f32 %v307_v9, %v306_v61  ;;  %v365_v3 = vadd.f32 %v364_v59, %v363_v62  ;;  %v370_v11 = vsel %vm96_vm1, %v351_v1, 0.0  ;;  %vm379_vm6 = vcmask 33824   ;;  %s469_s14 = sshll.u32 %s582_s2, 4  ;;  %s470_s14 = int_to_ptr.vmem [resolvable:$true] %s469_s14 }
  0x48   :  { %v374_v6 = vsel %vm96_vm1, %v352_v10, 0.0  ;;  %s545_s16 = scalar_lea.vmem %s470_s14, 128  ;;  %p550_p3 = scmp.lt.s32.totalorder %s470_s14, %s470_s14 }
  0x49   :  { %v310_v5 = vadd.f32 %v309_v63, %v308_v2  ;;  %v367_v7 = vadd.f32 %v366_v12, %v365_v3  ;;  %v446_v12 = vsub.f32 1.0, %v442_v0  ;;  %p546_p2 = scmp.ne.s32.totalorder %s470_s14, %s545_s16  ;;  %p551_p4 = scmp.lt.s32.totalorder %s545_s16, %s545_s16 }
  0x4b   :  { %311 = vadd.xlane.f32.xlu1 %v310_v5  ;;  %v369_v13 = vadd.f32 %v368_v4, %v367_v7  ;;  %p552_p5 = por %p551_p4, %p550_p3 }
  0x4d   :  { %v371_v15 = vadd.f32 %v370_v11, %v369_v13  ;;  %p553_p6 = pnand %p552_p5, %p546_p2 }
  0x4f   :  { %v373_v16 = vadd.f32 %v372_v14, %v371_v15 }
  0x51   :  { %v375_v17 = vadd.f32 %v374_v6, %v373_v16 }
  0x53   :  { %376 = vadd.xlane.f32.xlu0 %v375_v17 }
  0xcc   :  { %v113_v19 = vpop.xlane.xlu0 %112 }
  0xcd   :  { %v114_v20 = vadd.f32 %v113_v19, %v49_v18 }
  0xcf   :  { %116 = vst.msk [vmem:[#allocation2] sm:$0x3] %vm115_vm2, %v114_v20 }
  0xd0   :  { %v180_v21 = vpop.xlane.xlu0 %179 }
  0xd4   :  { %v247_v24 = vpop.xlane.xlu1 %246 }
  0xd6   :  { %v117_v22 = vld [vmem:[#allocation2] sm:$0x3] }
  0xd7   :  { %v181_v23 = vadd.f32 %v180_v21, %v117_v22 }
  0xd8   :  { %v312_v27 = vpop.xlane.xlu1 %311 }
  0xd9   :  { %183 = vst.msk [vmem:[#allocation2] sm:$0x3] %vm182_vm3, %v181_v23 }
  0xe0   :  { %v184_v25 = vld [vmem:[#allocation2] sm:$0x3]  ;;  %v377_v30 = vpop.xlane.xlu0 %376 }
  0xe1   :  { %v248_v26 = vadd.f32 %v247_v24, %v184_v25 }
  0xe3   :  { %250 = vst.msk [vmem:[#allocation2] sm:$0x3] %vm249_vm4, %v248_v26 }
  0xea   :  { %v251_v28 = vld [vmem:[#allocation2] sm:$0x3] }
  0xeb   :  { %v313_v29 = vadd.f32 %v312_v27, %v251_v28 }
  0xed   :  { %315 = vst.msk [vmem:[#allocation2] sm:$0x3] %vm314_vm5, %v313_v29 }
  0xf4   :  { %v316_v31 = vld [vmem:[#allocation2] sm:$0x3] }
  0xf5   :  { %v378_v32 = vadd.f32 %v377_v30, %v316_v31 }
  0xf7   :  { %380 = vst.msk [vmem:[#allocation2] sm:$0x3] %vm379_vm6, %v378_v32 }
  0xfe   :  { %v384_v33 = vld [vmem:[#allocation2] sm:$0x3] }
  0xff   :  { %495 = vrsqrt.f32 %v384_v33  ;;  %vm387_vm7 = vcmp.eq.f32.partialorder %v384_v33, inf  ;;  %v390_v36 = vand.u32 2147483648, %v384_v33  ;;  %vm389_vm8 = vcmp.eq.f32.partialorder %v384_v33, 0.0 }
 0x100   :  { %v403_v46 = vmul.f32 2.0, %v384_v33 }
 0x109   :  { %v496_v34 = vpop.eup %495 }
 0x10a   :  { %v386_v35 = vmul.f32 %v496_v34, %v384_v33 }
 0x10c   :  { %v388_v37 = vsel %vm387_vm7, %v384_v33, %v386_v35 }
 0x10d   :  { %v391_v38 = vsel %vm389_vm8, %v390_v36, %v388_v37 }
 0x10e   :  { %v392_v40 = vmax.f32 %v391_v38, 1e-12 }
 0x110   :  { %497 = vrcp.f32 %v392_v40 }
 0x11a   :  { %v498_v41 = vpop.eup %497 }
 0x11b   :  { %419 = vrot.lane.b32.xlu0 %v498_v41, %s577_s1  ;;  %405 = vrot.lane.b32.xlu1 %v498_v41, %s578_s8  ;;  %v395_v44 = vmul.f32 %v498_v41, %v384_v33 }
 0x11d   :  { %v396_v45 = vmul.f32 %v498_v41, %v395_v44 }
 0x18d   :  { %v406_v8 = vpop.permute.xlu1 %405  ;;  %v420_v42 = vpop.permute.xlu0 %419 }
 0x18e   :  { %v408_v39 = vmul.f32 %v498_v41, %v406_v8  ;;  %v422_v43 = vmul.f32 %v420_v42, %v384_v33 }
 0x190   :  { %410 = vrot.lane.b32.xlu1 %v408_v39, %s579_s9 }
 0x194   :  { %424 = vrot.lane.b32.xlu1 %v422_v43, %s578_s8 }
 0x198   :  { %398 = vrot.lane.b32.xlu1 %v396_v45, %s578_s8 }
 0x202   :  { %v411_v47 = vpop.permute.xlu1 %410 }
 0x203   :  { %v413_v48 = vmul.f32 %v411_v47, %v403_v46 }
 0x205   :  { %415 = vrot.lane.b32.xlu0 %v413_v48, %s580_s10 }
 0x206   :  { %v425_v49 = vpop.permute.xlu1 %424 }
 0x207   :  { %v427_v50 = vsub.f32 %v422_v43, %v425_v49 }
 0x209   :  { %v428_v51 = vmul.f32 2e-06, %v427_v50 }
 0x20a   :  { %v399_v52 = vpop.permute.xlu1 %398 }
 0x20b   :  { %430 = vrot.lane.b32.xlu1 %v428_v51, %s581_s11  ;;  %v401_v53 = vadd.f32 %v399_v52, %v396_v45 }
 0x20d   :  { %v402_v55 = vadd.f32 1.024e-09, %v401_v53 }
 0x277   :  { %v416_v54 = vpop.permute.xlu0 %415 }
 0x278   :  { %v418_v56 = vsub.f32 %v402_v55, %v416_v54 }
 0x27d   :  { %v431_v9 = vpop.permute.xlu1 %430 }
 0x27e   :  { %v433_v57 = vadd.f32 %v431_v9, %v418_v56 }
 0x280   :  { %v434_v58 = vmax.f32 %v433_v57, 0.0 }
 0x282   :  { %499 = vrsqrt.f32 %v434_v58  ;;  %vm437_vm9 = vcmp.eq.f32.partialorder %v434_v58, inf  ;;  %v440_v61 = vand.u32 2147483648, %v434_v58  ;;  %vm439_vm10 = vcmp.eq.f32.partialorder %v434_v58, 0.0 }
 0x283   :  { %v445_v4 = vmul.f32 %v442_v0, %v434_v58 }
 0x28c   :  { %v500_v59 = vpop.eup %499 }
 0x28d   :  { %v436_v60 = vmul.f32 %v500_v59, %v434_v58 }
 0x28f   :  { %v438_v62 = vsel %vm437_vm9, %v434_v58, %v436_v60 }
 0x290   :  { %v441_v63 = vsel %vm439_vm10, %v440_v61, %v438_v62 }
 0x291   :  { %v443_v1 = vsub.f32 1.0, %v441_v63 }
 0x293   :  { %v444_v2 = vmax.f32 %v443_v1, 0.0 }
 0x295   :  { %v447_v3 = vmul.f32 %v446_v12, %v444_v2 }
 0x297   :  { %v448_v5 = vmul.f32 %v447_v3, %v444_v2 }
 0x299   :  { %v449_v7 = vadd.f32 %v448_v5, %v445_v4 }
 0x29b   :  { %v450_v10 = vmul.f32 0.5, %v449_v7 }
 0x29d   :  { %v451_v11 = vsel %vm115_vm2, %v450_v10, 0.0 }
 0x29e   :  { %452 = vadd.xlane.f32.xlu0 %v451_v11 }
 0x32b   :  { %v453_v13 = vpop.xlane.xlu0 %452 }
 0x32c   :  { %v454_v14 = vrot.slane %v453_v13, 4 }
 0x32e   :  { %v455_v15 = vadd.f32 %v454_v14, %v453_v13 }
 0x330   :  { %v456_v6 = vrot.slane %v455_v15, 2 }
 0x332   :  { %v457_v16 = vadd.f32 %v456_v6, %v455_v15 }
 0x334   :  { %v458_v17 = vrot.slane %v457_v16, 1 }
 0x336   :  { %v459_v18 = vadd.f32 %v458_v17, %v457_v16 }
 0x338   :  { %479 = vpush %v459_v18 }
 0x369   :  { %s480_s15 = spop %479 }
 0x36a   :  { %v461_v19 = vstv %s480_s15 }
 0x36b   :  { %462 = vst [vmem:[#allocation8] sm:$0xff] %v461_v19 }
 0x36c   :  { %556 = shalt.err (!%p553_p6)
}
 0x36d   :  { %s557_s19 = scalar_lea.hbm %s741_s3, 128 }
 0x36e   :  { %p558_p7 = scmp.ne.s32.totalorder %s741_s3, %s557_s19  ;;  %p561_p8 = scmp.lt.u32.totalorder %s557_s19, %s741_s3 }
 0x370   :  { %p563_p9 = pnand %p561_p8, %p558_p7 }
 0x372   :  { %566 = shalt.err (!%p563_p9)
}
 0x373   :  { %472 = dma.vmem_to_hbm [thread:$0]  %s470_s14, 128, %s741_s3, [#allocation5]  }
 0x374   :  { %571 = dma.done.wait [#allocation5], 128  }
 0x375   :  { %572 = vsyncadd [#allocation5], 4294967168 }
 0x376   :  { %476 = vsyncpa [#allocation4], 1 }
 0x377   :  { %477 = vsyncpa [#allocation7], 1 }
 0x378   :  { %478 = vsyncpa [#allocation5], 1 }

</bundles_post_ra>
